<compile_context>
chip_gen: v6e
topology: v6e:2x2x1
jax: 0.10.0
libtpu: 0.0.40
codegen_flags: <defaults>
</compile_context>

<pallas_src>
import jax
import jax.numpy as jnp
from jax.experimental import pallas as pl
from jax.experimental.pallas import tpu as pltpu

HIDDEN = 128


def _round_up(x, m):
    return ((x + m - 1) // m) * m


def actor_critic_kernel(x_ref, w_h_ref, w_head_ref, b_head_ref, out_ref):
    # x_ref: (block_b, D+1) bf16  (last column is the constant 1 for the bias)
    # w_h_ref: (D+1, 2*HIDDEN) bf16, w_head_ref: (2*HIDDEN, head_w) bf16
    # b_head_ref: (1, head_w) f32, out_ref: (block_b, head_w) f32
    x = x_ref[...]
    # Fused hidden layer (bias already folded in): (B, D+1) @ (D+1, 256).
    h = jnp.dot(x, w_h_ref[...], preferred_element_type=jnp.float32)
    h = jnp.maximum(h, 0.0)
    # Fused block-diagonal heads: (B, 256) @ (256, head_w) -> [pi | v | pad].
    out_ref[...] = (
        jnp.dot(h.astype(jnp.bfloat16), w_head_ref[...],
                preferred_element_type=jnp.float32)
        + b_head_ref[...]
    )


def actor_critic_forward(state, params, *, block_b=None):
    """state: (B, D) float32. params: dict from init_params. Returns (pi, v)."""
    B, D = state.shape
    n_actions = params["n_actions"]
    head_w = params["w_head"].shape[1]
    d_aug = D + 1

    # Fold the hidden bias: append a constant-1 column, cast to bf16 for the MXU.
    x_aug = jnp.concatenate(
        [state, jnp.ones((B, 1), state.dtype)], axis=1
    ).astype(jnp.bfloat16)

    # Block-size selection:
    #   * small batches -> single block (one grid step, no pipeline overhead)
    #   * large batches -> >= 2 grid steps (v7x megacore sharding), blocks up
    #     to 1024 rows (amortizes the ~0.35us/step cost on single-TC v5e/v6e),
    #     always a multiple of 8 (sublane constraint).
    if block_b is None:
        if B <= 16:
            block_b = B
        else:
            block_b = min(_round_up(pl.cdiv(B, 2), 8), 1024)
    block_b = min(block_b, B)
    if block_b != B and block_b % 8 != 0:
        block_b = _round_up(block_b, 8)
    if block_b >= B:
        block_b = B
    grid = (pl.cdiv(B, block_b),)

    out = pl.pallas_call(
        actor_critic_kernel,
        out_shape=jax.ShapeDtypeStruct((B, head_w), jnp.float32),
        grid=grid,
        in_specs=[
            pl.BlockSpec((block_b, d_aug), lambda i: (i, 0)),
            pl.BlockSpec(params["w_h"].shape, lambda i: (0, 0)),     # resident
            pl.BlockSpec(params["w_head"].shape, lambda i: (0, 0)),  # resident
            pl.BlockSpec(params["b_head"].shape, lambda i: (0, 0)),  # resident
        ],
        out_specs=pl.BlockSpec((block_b, head_w), lambda i: (i, 0)),
        compiler_params=pltpu.CompilerParams(
            dimension_semantics=("parallel",)),
    )(x_aug, params["w_h"], params["w_head"], params["b_head"])

    # head_w is tiny (8 for CartPole) so these slices are near-free.
    pi = out[:, :n_actions]
    v = out[:, n_actions:n_actions + 1]
    return pi, v


def init_params(key, input_dims, n_actions, hidden=HIDDEN):
    """torch.nn.Linear-style init (uniform +/- 1/sqrt(fan_in)), stored (in, out).

    Returns both the raw per-layer f32 weights (for the reference check) and
    the fused bf16 weights actually fed to the kernel.
    """
    d = input_dims
    head_w = _round_up(n_actions + 1, 8)   # pi lanes [0, A), v at lane A
    ks = jax.random.split(key, 8)

    def lin(kw, kb, fan_in, fan_out):
        bound = 1.0 / jnp.sqrt(jnp.float32(fan_in))
        w = jax.random.uniform(kw, (fan_in, fan_out), jnp.float32, -bound, bound)
        b = jax.random.uniform(kb, (1, fan_out), jnp.float32, -bound, bound)
        return w, b

    w_pi1, b_pi1 = lin(ks[0], ks[1], d, hidden)
    w_v1, b_v1 = lin(ks[2], ks[3], d, hidden)
    w_pi, b_pi = lin(ks[4], ks[5], hidden, n_actions)
    w_v, b_v = lin(ks[6], ks[7], hidden, 1)

    # --- fused hidden layer: [pi1 | v1] along lanes, bias folded as last row ---
    w_h = jnp.concatenate([w_pi1, w_v1], axis=1)            # (D, 2*hidden)
    b_h = jnp.concatenate([b_pi1, b_v1], axis=1)            # (1, 2*hidden)
    w_h_aug = jnp.concatenate([w_h, b_h], axis=0)            # (D+1, 2*hidden)

    # --- fused block-diagonal heads, padded only to the next multiple of 8 ---
    w_head = jnp.zeros((2 * hidden, head_w), jnp.float32)
    w_head = w_head.at[:hidden, :n_actions].set(w_pi)                 # pi block
    w_head = w_head.at[hidden:, n_actions:n_actions + 1].set(w_v)     # v  block
    b_head = jnp.zeros((1, head_w), jnp.float32)
    b_head = b_head.at[:, :n_actions].set(b_pi)
    b_head = b_head.at[:, n_actions:n_actions + 1].set(b_v)

    return dict(
        n_actions=n_actions, hidden=hidden,
        # fused (kernel) params — bf16 weights, f32 head bias
        w_h=w_h_aug.astype(jnp.bfloat16),
        w_head=w_head.astype(jnp.bfloat16),
        b_head=b_head,
        # raw (reference) params
        w_pi1=w_pi1, b_pi1=b_pi1, w_v1=w_v1, b_v1=b_v1,
        w_pi=w_pi, b_pi=b_pi, w_v=w_v, b_v=b_v,
    )


def reference_forward(state, p):
    """Pure-JAX f32 replica of the original (unfused) PyTorch forward."""
    pi1 = jnp.maximum(state @ p["w_pi1"] + p["b_pi1"], 0.0)
    v1 = jnp.maximum(state @ p["w_v1"] + p["b_v1"], 0.0)
    return pi1 @ p["w_pi"] + p["b_pi"], v1 @ p["w_v"] + p["b_v"]


def reference_forward_bf16(state, p):
    """Reference matching the kernel's bf16-weight / f32-accumulate path."""
    B = state.shape[0]
    a = p["n_actions"]
    x = jnp.concatenate([state, jnp.ones((B, 1), state.dtype)], axis=1)
    x = x.astype(jnp.bfloat16).astype(jnp.float32)
    h = jnp.maximum(x @ p["w_h"].astype(jnp.float32), 0.0)
    h = h.astype(jnp.bfloat16).astype(jnp.float32)
    out = h @ p["w_head"].astype(jnp.float32) + p["b_head"]
    return out[:, :a], out[:, a:a + 1]


if __name__ == "__main__":
    # CartPole-like sizes: observation dim 4, 2 actions, batch of 8 states.
    B, D, A = 8, 4, 2
    key = jax.random.PRNGKey(0)
    k_param, k_state = jax.random.split(key)

    params = init_params(k_param, input_dims=D, n_actions=A)
    state = jax.random.normal(k_state, (B, D), dtype=jnp.float32)

    pi, v = actor_critic_forward(state, params)
    pi, v = jax.block_until_ready((pi, v))
    assert pi.shape == (B, A) and v.shape == (B, 1)

    # Check against a reference with the same bf16 weight quantization (tight),
    # and against the full-f32 unfused PyTorch-equivalent forward (loose, since
    # the kernel intentionally stores weights in bf16).
    pi_q, v_q = reference_forward_bf16(state, params)
    assert jnp.allclose(pi, pi_q, atol=1e-2, rtol=1e-2)
    assert jnp.allclose(v, v_q, atol=1e-2, rtol=1e-2)

    pi_ref, v_ref = reference_forward(state, params)
    assert jnp.allclose(pi, pi_ref, atol=5e-2, rtol=5e-2)
    assert jnp.allclose(v, v_ref, atol=5e-2, rtol=5e-2)

    # TODO(synk): calc_R / calc_loss / Categorical sampling are host-side RL
    # bookkeeping around the forward pass and are intentionally not in-kernel.

    print("KERNEL_OK")
</pallas_src>

<mosaic_0001>
module attributes {stable_mosaic.version = 11 : i64} {
  func.func @actor_critic_kernel(%arg0: i32, %arg1: memref<8x5xbf16, #tpu.memory_space<vmem>>, %arg2: memref<5x256xbf16, #tpu.memory_space<vmem>>, %arg3: memref<256x8xbf16, #tpu.memory_space<vmem>>, %arg4: memref<1x8xf32, #tpu.memory_space<vmem>>, %arg5: memref<8x8xf32, #tpu.memory_space<vmem>>) attributes {dimension_semantics = [#tpu.dimension_semantics<parallel>], iteration_bounds = array<i64: 1>, scalar_prefetch = 0 : i64, scratch_operands = 0 : i64, tpu.core_type = #tpu.core_type<tc>, window_params = [{transform_indices = @transform_0, window_bounds = array<i64: 8, 5>}, {pipeline_mode = #tpu.pipeline_mode<synchronous>, transform_indices = @transform_1, window_bounds = array<i64: 5, 256>}, {pipeline_mode = #tpu.pipeline_mode<synchronous>, transform_indices = @transform_2, window_bounds = array<i64: 256, 8>}, {pipeline_mode = #tpu.pipeline_mode<synchronous>, transform_indices = @transform_3, window_bounds = array<i64: 1, 8>}, {transform_indices = @transform_4, window_bounds = array<i64: 8, 8>}]} {
    %c0 = arith.constant 0 : index
    %c0_0 = arith.constant 0 : index
    %0 = vector.load %arg1[%c0, %c0_0] : memref<8x5xbf16, #tpu.memory_space<vmem>>, vector<8x5xbf16>
    %c0_1 = arith.constant 0 : index
    %c0_2 = arith.constant 0 : index
    %1 = vector.load %arg2[%c0_1, %c0_2] : memref<5x256xbf16, #tpu.memory_space<vmem>>, vector<5x256xbf16>
    %cst = arith.constant dense<0.000000e+00> : vector<8x256xf32>
    %2 = tpu.matmul %0, %1, %cst {dimension_numbers = #tpu.dot_dimension_numbers<[1], [0], [0], [1], [0, 0, 1, 1], [], []>} : vector<8x5xbf16>, vector<5x256xbf16>, vector<8x256xf32> -> vector<8x256xf32>
    %cst_3 = arith.constant 0.000000e+00 : f32
    %3 = vector.broadcast %cst_3 : f32 to vector<8x256xf32>
    %4 = arith.maximumf %2, %3 : vector<8x256xf32>
    %5 = arith.truncf %4 : vector<8x256xf32> to vector<8x256xbf16>
    %c0_4 = arith.constant 0 : index
    %c0_5 = arith.constant 0 : index
    %6 = vector.load %arg3[%c0_4, %c0_5] : memref<256x8xbf16, #tpu.memory_space<vmem>>, vector<256x8xbf16>
    %cst_6 = arith.constant dense<0.000000e+00> : vector<8x8xf32>
    %7 = tpu.matmul %5, %6, %cst_6 {dimension_numbers = #tpu.dot_dimension_numbers<[1], [0], [0], [1], [0, 0, 1, 1], [], []>} : vector<8x256xbf16>, vector<256x8xbf16>, vector<8x8xf32> -> vector<8x8xf32>
    %c0_7 = arith.constant 0 : index
    %c0_8 = arith.constant 0 : index
    %8 = vector.load %arg4[%c0_7, %c0_8] : memref<1x8xf32, #tpu.memory_space<vmem>>, vector<1x8xf32>
    %9 = vector.broadcast %8 : vector<1x8xf32> to vector<8x8xf32>
    %10 = arith.addf %7, %9 : vector<8x8xf32>
    %c0_9 = arith.constant 0 : index
    %c0_10 = arith.constant 0 : index
    %11 = vector.load %arg5[%c0_9, %c0_10] : memref<8x8xf32, #tpu.memory_space<vmem>>, vector<8x8xf32>
    tpu.vector_store %arg5[%c0_9, %c0_10], %10 {strides = array<i32>} : memref<8x8xf32, #tpu.memory_space<vmem>>, vector<8x8xf32>,
    return
  }
  func.func @transform_0(%arg0: i32) -> (i32, i32) {
    %c0_i32 = arith.constant 0 : i32
    %c0_i32_0 = arith.constant 0 : i32
    return %arg0, %c0_i32 : i32, i32
  }
  func.func @transform_1(%arg0: i32) -> (i32, i32) {
    %c0_i32 = arith.constant 0 : i32
    %c0_i32_0 = arith.constant 0 : i32
    %c0_i32_1 = arith.constant 0 : i32
    return %c0_i32, %c0_i32_0 : i32, i32
  }
  func.func @transform_2(%arg0: i32) -> (i32, i32) {
    %c0_i32 = arith.constant 0 : i32
    %c0_i32_0 = arith.constant 0 : i32
    %c0_i32_1 = arith.constant 0 : i32
    return %c0_i32, %c0_i32_0 : i32, i32
  }
  func.func @transform_3(%arg0: i32) -> (i32, i32) {
    %c0_i32 = arith.constant 0 : i32
    %c0_i32_0 = arith.constant 0 : i32
    %c0_i32_1 = arith.constant 0 : i32
    return %c0_i32, %c0_i32_0 : i32, i32
  }
  func.func @transform_4(%arg0: i32) -> (i32, i32) {
    %c0_i32 = arith.constant 0 : i32
    %c0_i32_0 = arith.constant 0 : i32
    return %arg0, %c0_i32 : i32, i32
  }
}

</mosaic_0001>

<bundles_post_ra>
// kernel: tpu_custom_call.1
= control target key start
LH: loop header
LB: loop body
LE: loop exit
PB: predicated region body
PF: predicated region fallthrough
CT: control target
= control target key end

     0   :  { %vm30_vm0 = vcmask 1041408   ;;  %vm31_vm1 = vcmask 1042432   ;;  %v361_v2 = vmov 65535   ;;  %v362_v5 = vmov 0   ;;  %s449_s0 = inlined_call_operand.vmem [shape: bf16[8,5], index: 0, kind: input, shape index: {}]   ;;  %s450_s1 = inlined_call_operand.vmem [shape: bf16[5,256], index: 1, kind: input, shape index: {}]   ;;  %s451_s2 = inlined_call_operand.vmem [shape: bf16[256,8], index: 2, kind: input, shape index: {}]   ;;  %s452_s3 = inlined_call_operand.vmem [shape: f32[1,8], index: 3, kind: input, shape index: {}]   ;;  %s453_s4 = inlined_call_operand.hbm [shape: f32[8,8], index: 4, kind: output, shape index: {}]  }
   0x1   :  { %v20_v0 = vld [vmem:[%s450_s1] sm:$0x77]  ;;  %v32_v3 = vsel %vm30_vm0, 4294967295, %v361_v2  ;;  %72 = vmatprep.mubr.bf16.mxu0 %v362_v5  ;;  %v323_v7 = vld [vmem:[%s451_s2 + $0x78] sm:$0xff]   ;;  %v325_v12 = vld [vmem:[%s451_s2 + $0x70] sm:$0xff]   ;;  %vm26_vm2 = vcmask 39936  }
   0x2   :  { %v277_v1 = vcombine.high %v20_v0, %v20_v0  ;;  %v276_v4 = vcombine.low %v20_v0, %v20_v0  ;;  %v33_v6 = vsel %vm31_vm1, %v32_v3, 0  ;;  %v324_v10 = vld [vmem:[%s451_s2 + $0x38] sm:$0xff]   ;;  %v19_v11 = vld [vmem:[%s449_s0] sm:$0xf]  ;;  %296 = vmatprep.subr.bf16.mxu1 %v323_v7  ;;  %v326_v13 = vld [vmem:[%s451_s2 + $0x30] sm:$0xff]  }
   0x3   :  { %297 = vmatpush3.bf16.msra.mxu1 %v324_v10  ;;  %v327_v14 = vld [vmem:[%s451_s2 + $0x68] sm:$0xff]   ;;  %v329_v16 = vld [vmem:[%s451_s2 + $0x60] sm:$0xff]   ;;  %v331_v18 = vld [vmem:[%s451_s2 + $0x58] sm:$0xff]  }
   0x4   :  { %v38_v8 = vand.u32 %v277_v1, %v33_v6  ;;  %v35_v9 = vand.u32 %v276_v4, %v33_v6  ;;  %298 = vmatprep.subr.bf16.mxu1 %v325_v12  ;;  %v328_v15 = vld [vmem:[%s451_s2 + $0x28] sm:$0xff]   ;;  %v330_v17 = vld [vmem:[%s451_s2 + $0x20] sm:$0xff]  }
   0x6   :  { %54 = vmatprep.subr.bf16.mxu0 %v38_v8 }
   0x7   :  { %55 = vmatpush1.bf16.msra.mxu0 %v35_v9  ;;  %299 = vmatpush3.bf16.msra.mxu1 %v326_v13 }
   0x8   :  { %300 = vmatprep.subr.bf16.mxu1 %v327_v14 }
   0xa   :  { %278 = vmatmul.mubr.msk.bf16.vlgmr.msra.gmra.mxu0 %vm26_vm2, %v19_v11 }
   0xb   :  { %301 = vmatpush3.bf16.msra.mxu1 %v328_v15 }
   0xc   :  { %302 = vmatprep.subr.bf16.mxu1 %v329_v16 }
   0xd   :  { %9 = vsyncpa [#allocation3], 0  ;;  %v332_v19 = vld [vmem:[%s451_s2 + $0x18] sm:$0xff]   ;;  %v333_v20 = vld [vmem:[%s451_s2 + $0x50] sm:$0xff]   ;;  %s363_s24 = smov [#allocation2]   ;;  %vm260_vm3 = vcmask 64512  }
   0xe   :  { %v334_v21 = vld [vmem:[%s451_s2 + $0x10] sm:$0xff]   ;;  %v335_v22 = vld [vmem:[%s451_s2 + $0x48] sm:$0xff]   ;;  %v337_v24 = vld [vmem:[%s451_s2 + $0x40] sm:$0xff]  }
   0xf   :  { %303 = vmatpush3.bf16.msra.mxu1 %v330_v17  ;;  %v336_v23 = vld [vmem:[%s451_s2 + $0x8] sm:$0xff]   ;;  %v338_v25 = vld [vmem:[%s451_s2] sm:$0xff]   ;;  %s268_s2 = sshll.u32 %s363_s24, 4  ;;  %s269_s2 = int_to_ptr.vmem [resolvable:$true] %s268_s2 }
  0x10   :  { %304 = vmatprep.subr.bf16.mxu1 %v331_v18  ;;  %v279_v35 = vld [vmem:[%s452_s3] ss:$0 sm:$0xff]  ;;  %s339_s25 = scalar_lea.vmem %s269_s2, 128  ;;  %p344_p1 = scmp.lt.s32.totalorder %s269_s2, %s269_s2 }
  0x11   :  { %p340_p0 = scmp.ne.s32.totalorder %s269_s2, %s339_s25  ;;  %p345_p2 = scmp.lt.s32.totalorder %s339_s25, %s339_s25 }
  0x13   :  { %305 = vmatpush3.bf16.msra.mxu1 %v332_v19  ;;  %p346_p3 = por %p345_p2, %p344_p1 }
  0x14   :  { %306 = vmatprep.subr.bf16.mxu1 %v333_v20 }
  0x15   :  { %p347_p4 = pnand %p346_p3, %p340_p0 }
  0x17   :  { %307 = vmatpush3.bf16.msra.mxu1 %v334_v21 }
  0x18   :  { %308 = vmatprep.subr.bf16.mxu1 %v335_v22 }
  0x1b   :  { %309 = vmatpush3.bf16.msra.mxu1 %v336_v23 }
  0x1c   :  { %310 = vmatprep.subr.bf16.mxu1 %v337_v24 }
  0x1f   :  { %311 = vmatpush3.bf16.msra.mxu1 %v338_v25 }
  0xca   :  { %v74_v26 = vpop.f32.mrf.mxu0 }
  0xcb   :  { %v81_v27 = vmax.f32 %v74_v26, 0.0 }
  0xcc   :  { %v76_v28 = vpop.f32.mrf.mxu0 }
  0xcd   :  { %v82_v29 = vmax.f32 %v76_v28, 0.0  ;;  %v83_v32 = vpack.c.bf16 %v81_v27, %v81_v27 }
  0xce   :  { %v78_v30 = vpop.f32.mrf.mxu0 }
  0xcf   :  { %v84_v31 = vpack.c.bf16 %v82_v29, %v82_v29 }
  0xd0   :  { %v79_v33 = vpop.f32.mrf.mxu0 }
  0xd1   :  { %252 = vmatprep.mubr.bf16.mxu1 %v84_v31 }
  0xd2   :  { %253 = vmatmul.mubr.bf16.vlgmr.msra.gmra.mxu1 %v83_v32 }
 0x192   :  { %v312_v34 = vpop.f32.mrf.mxu1 }
 0x194   :  { %v313_v36 = vpop.f32.mrf.mxu1 }
 0x195   :  { %v314_v37 = vadd.f32 %v313_v36, %v312_v34 }
 0x196   :  { %v315_v38 = vpop.f32.mrf.mxu1 }
 0x197   :  { %v255_v39 = vadd.f32 %v314_v37, %v279_v35 }
 0x198   :  { %v316_v40 = vpop.f32.mrf.mxu1 }
 0x199   :  { %261 = vst.msk [vmem:[#allocation2] sm:$0xff] %vm260_vm3, %v255_v39 }
 0x19a   :  { %350 = shalt.err (!%p347_p4)
}
 0x19b   :  { %271 = dma.vmem_to_hbm [thread:$0]  %s269_s2, 128, %s453_s4, [#allocation3]  }
 0x19c   :  { %359 = dma.done.wait [#allocation3], 128  }
 0x19d   :  { %360 = vsyncadd [#allocation3], 4294967168 }
 0x19e   :  { %275 = vsyncpa [#allocation3], 1 }

</bundles_post_ra>
